<compile_context>
chip_gen: v7x
topology: tpu7x:2x2x1
jax: 0.10.0
libtpu: 0.0.40
codegen_flags: <defaults>
</compile_context>

<pallas_src>
from math import log

import jax
import jax.numpy as jnp
import numpy as np
from jax.experimental import pallas as pl
from jax.experimental.pallas import tpu as pltpu


# ----------------------------------------------------------------------------
# Kernel
# ----------------------------------------------------------------------------
def make_edgeii_kernel(bt, N, K, C, c_aggr, c_x0, ln_eps=1e-5):
    """Per-grid-step kernel processing `bt` batch elements.

    Ref shapes (per grid step i over batch tiles):
      msg_ref  : (bt*K*N, 2C) bf16   packed [x_i, x_j - x_i] edge features,
                                     row = b_local*(K*N) + k*N + n
      x0_ref   : (bt*N, C)   f32     initial residual features
      wpre_ref : (2C, C)     bf16    pre-nn 1x1-conv weight^T with eval-BN folded
      bpre_ref : (1, C)      f32     folded conv+BN bias
      wres_ref : (2C, C)     f32     [beta*W1^T ; beta*W2^T] stacked
      gamma/bln: (1, C)      f32     LayerNorm affine
      out_ref  : (bt*N, C)   f32
    """

    def _tree_max_over_k(m):
        # m: (bt, k, N, C) -> (bt, 1, N, C); balanced pairwise tree, log2(K)
        # deep (static slices over an untiled leading dim are free).
        k = m.shape[1]
        while k > 1:
            half = (k + 1) // 2
            m = jnp.maximum(m[:, :half], m[:, k - half:k])  # overlap ok for max
            k = half
        return m

    def kernel(msg_ref, x0_ref, wpre_ref, bpre_ref, wres_ref,
               gamma_ref, bln_ref, out_ref):
        # --- pre-nn: folded (1x1 conv + eval BatchNorm) + ReLU ----------------
        # One bf16 MXU matmul over all bt*K*N edge rows (contraction dim = 2C).
        h = jnp.dot(msg_ref[...], wpre_ref[...],
                    preferred_element_type=jnp.float32)             # (bt*K*N, C)
        h = jnp.maximum(h + bpre_ref[...], 0.0)

        # --- max aggregation over the K neighbours (tree reduce) -------------
        aggr = _tree_max_over_k(h.reshape(bt, K, N, C)).reshape(bt * N, C)

        x0 = x0_ref[...]                                            # (bt*N, C)

        # --- GCN-II combination: fused residual matmul ------------------------
        # [aggr, x0] @ [beta*W1^T ; beta*W2^T]  (beta folded host-side).
        lhs = jnp.concatenate([aggr, x0], axis=-1)                  # (bt*N, 2C)
        out = jnp.dot(lhs, wres_ref[...], preferred_element_type=jnp.float32)
        out = out + c_aggr * aggr + c_x0 * x0
        out = jnp.maximum(out, 0.0)                                 # ReLU

        # --- LayerNorm over channels (lane reduction + EUP rsqrt) -------------
        mu = jnp.mean(out, axis=-1, keepdims=True)
        var = jnp.mean((out - mu) ** 2, axis=-1, keepdims=True)
        out = (out - mu) * jax.lax.rsqrt(var + ln_eps)
        out_ref[...] = out * gamma_ref[...] + bln_ref[...]

    return kernel


# ----------------------------------------------------------------------------
# Wrapper
# ----------------------------------------------------------------------------
def edgeii_forward(x, x_0, edge_index, params, *, alpha, beta, ln_eps=1e-5):
    """x: (B, C, N, 1) f32, x_0: (B, N, C) f32, edge_index: (2, B, N, K) int32.

    Returns (B, C, N, 1) f32, matching the PyTorch module's output layout.
    """
    B, C, N, _ = x.shape
    K = edge_index.shape[-1]
    assert N % 8 == 0, "row-blocked specs need N divisible by the sublane size"

    c_aggr = (1.0 - alpha) * (1.0 - beta)
    c_x0 = alpha * (1.0 - beta)
    mm_dtype = params["wpre_t"].dtype

    # TODO(synk): remove_self_loops on the dense (2,B,N,K) edge_index is pure
    # index plumbing; it is assumed to have been applied upstream.

    # ---- gather / pack edge features (wrapper-side index plumbing) ----------
    # TODO(synk): for bandwidth-bound deployments move this K-fold gather into
    # the kernel (scalar-prefetched indices + DMA/row gather) so the (B,K*N,2C)
    # edge tensor never round-trips through HBM.
    x_perm = jnp.transpose(x[..., 0], (0, 2, 1))                     # (B, N, C)
    i0 = jnp.transpose(edge_index[0], (0, 2, 1)).reshape(B, K * N)   # k-major
    i1 = jnp.transpose(edge_index[1], (0, 2, 1)).reshape(B, K * N)
    x_j = jnp.take_along_axis(x_perm, i0[..., None], axis=1)         # (B,K*N,C)
    x_i = jnp.take_along_axis(x_perm, i1[..., None], axis=1)
    # Pack [x_i, x_j - x_i]; bf16 halves HBM bytes of the big edge tensor and
    # feeds the MXU at full rate (accumulation stays f32 in-kernel).
    msg = jnp.concatenate([x_i, x_j - x_i], axis=-1).astype(mm_dtype)
    msg = msg.reshape(B * K * N, 2 * C)
    x0_flat = x_0.astype(jnp.float32).reshape(B * N, C)

    # ---- batch tiling: prefer exactly 2 "parallel" grid steps (v7x has 2 TCs)
    # while keeping double-buffered blocks inside a conservative VMEM budget.
    def _block_bytes(bt):
        return 2 * (bt * K * N * 2 * C * msg.dtype.itemsize          # msg
                    + 2 * bt * N * C * 4)                            # x0 + out
    bt = 1
    if B % 2 == 0 and _block_bytes(B // 2) <= (24 << 20):
        bt = B // 2
    grid = (B // bt,)

    kernel = make_edgeii_kernel(bt, N, K, C, c_aggr, c_x0, ln_eps)

    out_flat = pl.pallas_call(
        kernel,
        out_shape=jax.ShapeDtypeStruct((B * N, C), jnp.float32),
        grid=grid,
        in_specs=[
            pl.BlockSpec((bt * K * N, 2 * C), lambda i: (i, 0)),   # msg
            pl.BlockSpec((bt * N, C), lambda i: (i, 0)),           # x_0
            pl.BlockSpec((2 * C, C), lambda i: (0, 0)),            # folded conv W^T
            pl.BlockSpec((1, C), lambda i: (0, 0)),                # folded conv b
            pl.BlockSpec((2 * C, C), lambda i: (0, 0)),            # [b*W1^T; b*W2^T]
            pl.BlockSpec((1, C), lambda i: (0, 0)),                # LN gamma
            pl.BlockSpec((1, C), lambda i: (0, 0)),                # LN beta
        ],
        out_specs=pl.BlockSpec((bt * N, C), lambda i: (i, 0)),
        compiler_params=pltpu.CompilerParams(
            dimension_semantics=("parallel",)),
    )(msg, x0_flat, params["wpre_t"], params["bpre"], params["wres_t"],
      params["gamma"], params["beta_ln"])

    out = out_flat.reshape(B, N, C)
    return jnp.transpose(out, (0, 2, 1))[..., None]                  # (B,C,N,1)


# ----------------------------------------------------------------------------
# Parameter preparation (host-side folding) and pure-JAX reference
# ----------------------------------------------------------------------------
def prepare_params(raw, *, beta, bn_eps=1e-5, matmul_dtype=jnp.bfloat16):
    """Fold eval-mode BatchNorm into the pre-nn conv; pre-scale W1/W2 by beta."""
    scale = raw["bn_gamma"] / jnp.sqrt(raw["bn_var"] + bn_eps)         # (C,)
    w_fold = raw["w_conv"] * scale[:, None]                            # (C, 2C)
    b_fold = (raw["b_conv"] - raw["bn_mean"]) * scale + raw["bn_beta"]  # (C,)
    wres = jnp.concatenate([raw["w1"].T, raw["w2"].T], axis=0) * beta  # (2C, C)
    return {
        "wpre_t": jnp.asarray(w_fold.T, dtype=matmul_dtype),           # (2C, C)
        "bpre": b_fold.reshape(1, -1).astype(jnp.float32),             # (1, C)
        "wres_t": wres.astype(jnp.float32),                            # (2C, C)
        "gamma": raw["ln_gamma"].reshape(1, -1).astype(jnp.float32),
        "beta_ln": raw["ln_beta"].reshape(1, -1).astype(jnp.float32),
    }


def edgeii_reference(x, x_0, edge_index, params, *, alpha, beta, ln_eps=1e-5):
    """Pure-JAX reference mirroring the kernel's math/precision for checking."""
    B, C, N, _ = x.shape
    c_aggr = (1.0 - alpha) * (1.0 - beta)
    c_x0 = alpha * (1.0 - beta)
    x_perm = jnp.transpose(x[..., 0], (0, 2, 1))                       # (B,N,C)
    b_idx = jnp.arange(B)[:, None, None]
    x_j = x_perm[b_idx, edge_index[0]]                                 # (B,N,K,C)
    x_i = x_perm[b_idx, edge_index[1]]
    msg = jnp.concatenate([x_i, x_j - x_i], axis=-1).astype(params["wpre_t"].dtype)
    h = jnp.einsum("bnkc,cd->bnkd", msg, params["wpre_t"],
                   preferred_element_type=jnp.float32)
    h = jnp.maximum(h + params["bpre"], 0.0)
    aggr = jnp.max(h, axis=2)                                          # (B,N,C)
    lhs = jnp.concatenate([aggr, x_0.astype(jnp.float32)], axis=-1)
    out = jnp.einsum("bnc,cd->bnd", lhs, params["wres_t"],
                     preferred_element_type=jnp.float32)
    out = out + c_aggr * aggr + c_x0 * x_0
    out = jnp.maximum(out, 0.0)
    mu = jnp.mean(out, axis=-1, keepdims=True)
    var = jnp.mean((out - mu) ** 2, axis=-1, keepdims=True)
    out = (out - mu) / jnp.sqrt(var + ln_eps)
    out = out * params["gamma"] + params["beta_ln"]
    return jnp.transpose(out, (0, 2, 1))[..., None]                    # (B,C,N,1)


# ----------------------------------------------------------------------------
# Harness
# ----------------------------------------------------------------------------
if __name__ == "__main__":
    B, C, N, K = 2, 128, 16, 8        # small; C multiple of 128 -> lane-dense
    alpha = 0.1
    theta, layer = 0.5, 2
    beta = log(theta / layer + 1.0)   # GCN-II beta

    key = jax.random.PRNGKey(0)
    ks = jax.random.split(key, 14)

    x = jax.random.normal(ks[0], (B, C, N, 1), dtype=jnp.float32)
    x_0 = jax.random.normal(ks[1], (B, N, C), dtype=jnp.float32)
    nn_idx = jax.random.randint(ks[2], (B, N, K), 0, N, dtype=jnp.int32)
    center = jnp.broadcast_to(jnp.arange(N, dtype=jnp.int32)[None, :, None],
                              (B, N, K))
    edge_index = jnp.stack([nn_idx, center], axis=0)                   # (2,B,N,K)

    bc = 1.0 / np.sqrt(2 * C)   # conv fan_in = 2C
    bl = 1.0 / np.sqrt(C)       # linear fan_in = C
    raw = {
        "w_conv": jax.random.uniform(ks[3], (C, 2 * C), jnp.float32, -bc, bc),
        "b_conv": jax.random.uniform(ks[4], (C,), jnp.float32, -bc, bc),
        "bn_gamma": jax.random.uniform(ks[5], (C,), jnp.float32, 0.5, 1.5),
        "bn_beta": 0.1 * jax.random.normal(ks[6], (C,), jnp.float32),
        "bn_mean": 0.1 * jax.random.normal(ks[7], (C,), jnp.float32),
        "bn_var": jax.random.uniform(ks[8], (C,), jnp.float32, 0.5, 1.5),
        "w1": jax.random.uniform(ks[9], (C, C), jnp.float32, -bl, bl),
        "w2": jax.random.uniform(ks[10], (C, C), jnp.float32, -bl, bl),
        "ln_gamma": jnp.ones((C,), jnp.float32),
        "ln_beta": jnp.zeros((C,), jnp.float32),
    }
    params = prepare_params(raw, beta=beta)

    fwd = jax.jit(lambda xa, x0a, ei, p: edgeii_forward(
        xa, x0a, ei, p, alpha=alpha, beta=beta))
    out = fwd(x, x_0, edge_index, params)
    out = jax.block_until_ready(out)

    ref = edgeii_reference(x, x_0, edge_index, params, alpha=alpha, beta=beta)
    assert out.shape == (B, C, N, 1), out.shape
    np.testing.assert_allclose(np.asarray(out), np.asarray(ref),
                               rtol=2e-3, atol=2e-3)

    print("KERNEL_OK")
</pallas_src>

<mosaic_0001>
module attributes {stable_mosaic.version = 11 : i64} {
  func.func @kernel(%arg0: i32, %arg1: memref<128x256xbf16, #tpu.memory_space<vmem>>, %arg2: memref<16x128xf32, #tpu.memory_space<vmem>>, %arg3: memref<256x128xbf16, #tpu.memory_space<vmem>>, %arg4: memref<1x128xf32, #tpu.memory_space<vmem>>, %arg5: memref<256x128xf32, #tpu.memory_space<vmem>>, %arg6: memref<1x128xf32, #tpu.memory_space<vmem>>, %arg7: memref<1x128xf32, #tpu.memory_space<vmem>>, %arg8: memref<16x128xf32, #tpu.memory_space<vmem>>) attributes {dimension_semantics = [#tpu.dimension_semantics<parallel>], iteration_bounds = array<i64: 2>, scalar_prefetch = 0 : i64, scratch_operands = 0 : i64, tpu.core_type = #tpu.core_type<tc>, window_params = [{transform_indices = @transform_0, window_bounds = array<i64: 128, 256>}, {transform_indices = @transform_1, window_bounds = array<i64: 16, 128>}, {pipeline_mode = #tpu.pipeline_mode<synchronous>, transform_indices = @transform_2, window_bounds = array<i64: 256, 128>}, {pipeline_mode = #tpu.pipeline_mode<synchronous>, transform_indices = @transform_3, window_bounds = array<i64: 1, 128>}, {pipeline_mode = #tpu.pipeline_mode<synchronous>, transform_indices = @transform_4, window_bounds = array<i64: 256, 128>}, {pipeline_mode = #tpu.pipeline_mode<synchronous>, transform_indices = @transform_5, window_bounds = array<i64: 1, 128>}, {pipeline_mode = #tpu.pipeline_mode<synchronous>, transform_indices = @transform_6, window_bounds = array<i64: 1, 128>}, {transform_indices = @transform_7, window_bounds = array<i64: 16, 128>}]} {
    %c0 = arith.constant 0 : index
    %c0_0 = arith.constant 0 : index
    %0 = vector.load %arg1[%c0, %c0_0] : memref<128x256xbf16, #tpu.memory_space<vmem>>, vector<128x256xbf16>
    %c0_1 = arith.constant 0 : index
    %c0_2 = arith.constant 0 : index
    %1 = vector.load %arg3[%c0_1, %c0_2] : memref<256x128xbf16, #tpu.memory_space<vmem>>, vector<256x128xbf16>
    %cst = arith.constant dense<0.000000e+00> : vector<128x128xf32>
    %2 = tpu.matmul %0, %1, %cst {dimension_numbers = #tpu.dot_dimension_numbers<[1], [0], [0], [1], [0, 0, 1, 1], [], []>} : vector<128x256xbf16>, vector<256x128xbf16>, vector<128x128xf32> -> vector<128x128xf32>
    %c0_3 = arith.constant 0 : index
    %c0_4 = arith.constant 0 : index
    %3 = vector.load %arg4[%c0_3, %c0_4] : memref<1x128xf32, #tpu.memory_space<vmem>>, vector<1x128xf32>
    %4 = vector.broadcast %3 : vector<1x128xf32> to vector<128x128xf32>
    %5 = arith.addf %2, %4 : vector<128x128xf32>
    %cst_5 = arith.constant 0.000000e+00 : f32
    %6 = vector.broadcast %cst_5 : f32 to vector<128x128xf32>
    %7 = arith.maximumf %5, %6 : vector<128x128xf32>
    %8 = vector.shape_cast %7 : vector<128x128xf32> to vector<1x8x16x128xf32>
    %9 = vector.extract_strided_slice %8 {offsets = [0, 0, 0, 0], sizes = [1, 4, 16, 128], strides = [1, 1, 1, 1]} : vector<1x8x16x128xf32> to vector<1x4x16x128xf32>
    %10 = vector.extract_strided_slice %8 {offsets = [0, 4, 0, 0], sizes = [1, 4, 16, 128], strides = [1, 1, 1, 1]} : vector<1x8x16x128xf32> to vector<1x4x16x128xf32>
    %11 = arith.maximumf %9, %10 : vector<1x4x16x128xf32>
    %12 = vector.extract_strided_slice %11 {offsets = [0, 0, 0, 0], sizes = [1, 2, 16, 128], strides = [1, 1, 1, 1]} : vector<1x4x16x128xf32> to vector<1x2x16x128xf32>
    %13 = vector.extract_strided_slice %11 {offsets = [0, 2, 0, 0], sizes = [1, 2, 16, 128], strides = [1, 1, 1, 1]} : vector<1x4x16x128xf32> to vector<1x2x16x128xf32>
    %14 = arith.maximumf %12, %13 : vector<1x2x16x128xf32>
    %15 = vector.extract_strided_slice %14 {offsets = [0, 0, 0, 0], sizes = [1, 1, 16, 128], strides = [1, 1, 1, 1]} : vector<1x2x16x128xf32> to vector<1x1x16x128xf32>
    %16 = vector.extract_strided_slice %14 {offsets = [0, 1, 0, 0], sizes = [1, 1, 16, 128], strides = [1, 1, 1, 1]} : vector<1x2x16x128xf32> to vector<1x1x16x128xf32>
    %17 = arith.maximumf %15, %16 : vector<1x1x16x128xf32>
    %18 = vector.shape_cast %17 : vector<1x1x16x128xf32> to vector<16x128xf32>
    %c0_6 = arith.constant 0 : index
    %c0_7 = arith.constant 0 : index
    %19 = vector.load %arg2[%c0_6, %c0_7] : memref<16x128xf32, #tpu.memory_space<vmem>>, vector<16x128xf32>
    %20 = tpu.concatenate %18, %19 in 1 : vector<16x128xf32>, vector<16x128xf32> -> vector<16x256xf32>
    %c0_8 = arith.constant 0 : index
    %c0_9 = arith.constant 0 : index
    %21 = vector.load %arg5[%c0_8, %c0_9] : memref<256x128xf32, #tpu.memory_space<vmem>>, vector<256x128xf32>
    %cst_10 = arith.constant dense<0.000000e+00> : vector<16x128xf32>
    %22 = tpu.matmul %20, %21, %cst_10 {dimension_numbers = #tpu.dot_dimension_numbers<[1], [0], [0], [1], [0, 0, 1, 1], [], []>} : vector<16x256xf32>, vector<256x128xf32>, vector<16x128xf32> -> vector<16x128xf32>
    %cst_11 = arith.constant 0.699170828 : f32
    %23 = vector.broadcast %cst_11 : f32 to vector<16x128xf32>
    %24 = arith.mulf %23, %18 : vector<16x128xf32>
    %25 = arith.addf %22, %24 : vector<16x128xf32>
    %cst_12 = arith.constant 0.0776856467 : f32
    %26 = vector.broadcast %cst_12 : f32 to vector<16x128xf32>
    %27 = arith.mulf %26, %19 : vector<16x128xf32>
    %28 = arith.addf %25, %27 : vector<16x128xf32>
    %cst_13 = arith.constant 0.000000e+00 : f32
    %29 = vector.broadcast %cst_13 : f32 to vector<16x128xf32>
    %30 = arith.maximumf %28, %29 : vector<16x128xf32>
    %cst_14 = arith.constant dense<0.000000e+00> : vector<16xf32>
    %31 = vector.multi_reduction <add>, %30, %cst_14 [1] : vector<16x128xf32> to vector<16xf32>
    %32 = vector.shape_cast %31 : vector<16xf32> to vector<16x1xf32>
    %cst_15 = arith.constant 1.280000e+02 : f32
    %33 = vector.broadcast %cst_15 : f32 to vector<16x1xf32>
    %34 = arith.divf %32, %33 : vector<16x1xf32>
    %35 = vector.broadcast %34 : vector<16x1xf32> to vector<16x128xf32>
    %36 = arith.subf %30, %35 : vector<16x128xf32>
    %37 = arith.mulf %36, %36 : vector<16x128xf32>
    %cst_16 = arith.constant dense<0.000000e+00> : vector<16xf32>
    %38 = vector.multi_reduction <add>, %37, %cst_16 [1] : vector<16x128xf32> to vector<16xf32>
    %39 = vector.shape_cast %38 : vector<16xf32> to vector<16x1xf32>
    %cst_17 = arith.constant 1.280000e+02 : f32
    %40 = vector.broadcast %cst_17 : f32 to vector<16x1xf32>
    %41 = arith.divf %39, %40 : vector<16x1xf32>
    %42 = vector.broadcast %34 : vector<16x1xf32> to vector<16x128xf32>
    %43 = arith.subf %30, %42 : vector<16x128xf32>
    %cst_18 = arith.constant 9.99999974E-6 : f32
    %44 = vector.broadcast %cst_18 : f32 to vector<16x1xf32>
    %45 = arith.addf %41, %44 : vector<16x1xf32>
    %46 = math.rsqrt %45 : vector<16x1xf32>
    %47 = vector.broadcast %46 : vector<16x1xf32> to vector<16x128xf32>
    %48 = arith.mulf %43, %47 : vector<16x128xf32>
    %c0_19 = arith.constant 0 : index
    %c0_20 = arith.constant 0 : index
    %49 = vector.load %arg6[%c0_19, %c0_20] : memref<1x128xf32, #tpu.memory_space<vmem>>, vector<1x128xf32>
    %50 = vector.broadcast %49 : vector<1x128xf32> to vector<16x128xf32>
    %51 = arith.mulf %48, %50 : vector<16x128xf32>
    %c0_21 = arith.constant 0 : index
    %c0_22 = arith.constant 0 : index
    %52 = vector.load %arg7[%c0_21, %c0_22] : memref<1x128xf32, #tpu.memory_space<vmem>>, vector<1x128xf32>
    %53 = vector.broadcast %52 : vector<1x128xf32> to vector<16x128xf32>
    %54 = arith.addf %51, %53 : vector<16x128xf32>
    %c0_23 = arith.constant 0 : index
    %c0_24 = arith.constant 0 : index
    %55 = vector.load %arg8[%c0_23, %c0_24] : memref<16x128xf32, #tpu.memory_space<vmem>>, vector<16x128xf32>
    tpu.vector_store %arg8[%c0_23, %c0_24], %54 {strides = array<i32>} : memref<16x128xf32, #tpu.memory_space<vmem>>, vector<16x128xf32>,
    return
  }
  func.func @transform_0(%arg0: i32) -> (i32, i32) {
    %c0_i32 = arith.constant 0 : i32
    %c0_i32_0 = arith.constant 0 : i32
    return %arg0, %c0_i32 : i32, i32
  }
  func.func @transform_1(%arg0: i32) -> (i32, i32) {
    %c0_i32 = arith.constant 0 : i32
    %c0_i32_0 = arith.constant 0 : i32
    return %arg0, %c0_i32 : i32, i32
  }
  func.func @transform_2(%arg0: i32) -> (i32, i32) {
    %c0_i32 = arith.constant 0 : i32
    %c0_i32_0 = arith.constant 0 : i32
    %c0_i32_1 = arith.constant 0 : i32
    return %c0_i32, %c0_i32_0 : i32, i32
  }
  func.func @transform_3(%arg0: i32) -> (i32, i32) {
    %c0_i32 = arith.constant 0 : i32
    %c0_i32_0 = arith.constant 0 : i32
    %c0_i32_1 = arith.constant 0 : i32
    return %c0_i32, %c0_i32_0 : i32, i32
  }
  func.func @transform_4(%arg0: i32) -> (i32, i32) {
    %c0_i32 = arith.constant 0 : i32
    %c0_i32_0 = arith.constant 0 : i32
    %c0_i32_1 = arith.constant 0 : i32
    return %c0_i32, %c0_i32_0 : i32, i32
  }
  func.func @transform_5(%arg0: i32) -> (i32, i32) {
    %c0_i32 = arith.constant 0 : i32
    %c0_i32_0 = arith.constant 0 : i32
    %c0_i32_1 = arith.constant 0 : i32
    return %c0_i32, %c0_i32_0 : i32, i32
  }
  func.func @transform_6(%arg0: i32) -> (i32, i32) {
    %c0_i32 = arith.constant 0 : i32
    %c0_i32_0 = arith.constant 0 : i32
    %c0_i32_1 = arith.constant 0 : i32
    return %c0_i32, %c0_i32_0 : i32, i32
  }
  func.func @transform_7(%arg0: i32) -> (i32, i32) {
    %c0_i32 = arith.constant 0 : i32
    %c0_i32_0 = arith.constant 0 : i32
    return %arg0, %c0_i32 : i32, i32
  }
}

</mosaic_0001>

<bundles_post_ra>
// kernel: _lambda_.1
= control target key start
LH: loop header
LB: loop body
LE: loop exit
PB: predicated region body
PF: predicated region fallthrough
CT: control target
= control target key end

     0   :  { %12 = vsyncpa [#allocation3], 0  ;;  %s1575_s0 = inlined_call_operand.vmem [shape: bf16[256,256], index: 0, kind: input, shape index: {}]   ;;  %s1576_s1 = inlined_call_operand.vmem [shape: f32[32,128], index: 1, kind: input, shape index: {}]   ;;  %s1577_s2 = inlined_call_operand.vmem [shape: bf16[256,128], index: 2, kind: input, shape index: {}]   ;;  %s1578_s3 = inlined_call_operand.vmem [shape: f32[1,128], index: 3, kind: input, shape index: {}]   ;;  %s1579_s4 = inlined_call_operand.vmem [shape: f32[256,128], index: 4, kind: input, shape index: {}]   ;;  %s1580_s5 = inlined_call_operand.vmem [shape: f32[1,128], index: 5, kind: input, shape index: {}]   ;;  %s1581_s6 = inlined_call_operand.vmem [shape: f32[1,128], index: 6, kind: input, shape index: {}]   ;;  %s1582_s7 = inlined_call_operand.hbm [shape: f32[32,128], index: 7, kind: output, shape index: {}]  }
   0x1   :  { %14 = vsyncpa [#allocation3 + $0x1], 0  ;;  %s1290_s24 = smov 0   ;;  %s1292_s25 = smov 0  }
   0x2   :  { %s1294_s26 = smov 0   ;;  %s1296_s27 = smov 0  }
   0x3 LB: > { %s1311_s28 = sadd.s32 4294967295, %s1245_s27   ;;  %s912_s29 = sadd.s32 4294967294, %s1245_s27   ;;  %s1245_s27 = sphi %s1296_s27, %s1588_s27   ;;  %s1241_s26 = sphi %s1294_s26, %s1587_s26   ;;  %s1237_s25 = sphi %s1292_s25, %s1586_s25   ;;  %s1233_s24 = sphi %s1290_s24, %s1585_s24  }
   0x4   : > { %s1315_s30 = sadd.s32 1, %s1245_s27   ;;  %s184_s8 = sadd.s32 1, %s1241_s26 }
   0x5   : > { %s181_s9 = ssub.s32 %s1245_s27, %s1315_s30  ;;  %p194_p0 = scmp.ne.s32.totalorder %s1241_s26, %s1237_s25 }
   0x6   : > { %p182_p1 = scmp.eq.s32.totalorder %s181_s9, 0  ;;  %p195_p2 = scmp.eq.s32.totalorder %s1311_s28, 1 }
   0x7   : > { %p200_p3 = scmp.ne.s32.totalorder %s1237_s25, %s1233_s24  ;;  %p201_p4 = scmp.eq.s32.totalorder %s912_s29, 1 }
   0x8   : > { %s1326_s10 = scalar_select %p182_p1, %s1241_s26, %s184_s8  }
   0x9   : > { %p1328_p5 = por %p195_p2, %p194_p0  ;;  %p1332_p6 = por %p201_p4, %p200_p3 }
   0xa   : > { %p915_p7 = scmp.ge.s32.totalorder %s1245_s27, 1  ;;  %p253_p8 = scmp.lt.s32.totalorder %s1245_s27, 3 }
   0xc   : > { %p254_p9 = pnand %p915_p7, %p253_p8 }
   0xd   : > { %v1139_v0 = vld [vmem:[%s1577_s2 + $0x40] sm:$0xff] (!%p254_p9)   ;;  %s917_s15 = sshll.u32 (!%p254_p9), %s1311_s28, 4  ;;  %v1141_v2 = vld [vmem:[%s1577_s2 + $0x48] sm:$0xff] (!%p254_p9)   ;;  %v1143_v4 = vld [vmem:[%s1577_s2 + $0x50] sm:$0xff] (!%p254_p9)   ;;  %s920_s29 = sshll.u32 (!%p254_p9), %s1311_s28, 1 }
   0xe   : > { %257 = sbr.rel (%p254_p9) target bundleno = 878 (0x36e), region = 48  ;;  %v1140_v1 = vld [vmem:[%s1577_s2] sm:$0xff] (!%p254_p9)   ;;  %964 = vmatprep.subr.bf16.mxu0 (!%p254_p9), %v1139_v0  ;;  %v1142_v3 = vld [vmem:[%s1577_s2 + $0x8] sm:$0xff] (!%p254_p9)   ;;  %p292_p10 = scmp.lt.s32.totalorder (!%p254_p9), %s917_s15, 31  ;;  %v1144_v5 = vld [vmem:[%s1577_s2 + $0x10] sm:$0xff] (!%p254_p9)  }
   0xf   : > { %965 = vmatpush3.bf16.msra.mxu0 (!%p254_p9), %v1140_v1  ;;  %v1145_v6 = vld [vmem:[%s1577_s2 + $0x58] sm:$0xff] (!%p254_p9)   ;;  %v1147_v8 = vld [vmem:[%s1577_s2 + $0x60] sm:$0xff] (!%p254_p9)   ;;  %v1149_v10 = vld [vmem:[%s1577_s2 + $0x68] sm:$0xff] (!%p254_p9)   ;;  %p299_p11 = scmp.lt.s32.totalorder (!%p254_p9), %s920_s29, 3  ;;  %s288_s8 = sand.u32 (!%p254_p9), 1, %s1237_s25  }
  0x10   : > { %966 = vmatprep.subr.bf16.mxu0 (!%p254_p9), %v1141_v2  ;;  %v1146_v7 = vld [vmem:[%s1577_s2 + $0x18] sm:$0xff] (!%p254_p9)   ;;  %v1148_v9 = vld [vmem:[%s1577_s2 + $0x20] sm:$0xff] (!%p254_p9)   ;;  %v1150_v12 = vld [vmem:[%s1577_s2 + $0x28] sm:$0xff] (!%p254_p9)   ;;  %s916_s13 = sshll.u32 (!%p254_p9), %s288_s8, 4  ;;  %s1534_s23 = scalar_lea.sflag (!%p254_p9), [#allocation3], %s288_s8 }
  0x11   : > { %v1151_v13 = vld [vmem:[%s1577_s2 + $0x70] sm:$0xff] (!%p254_p9)   ;;  %v1153_v15 = vld [vmem:[%s1577_s2 + $0x78] sm:$0xff] (!%p254_p9)   ;;  %v682_v32 = vld [vmem:[%s1579_s4 + $0x80] sm:$0xff] (!%p254_p9) }
  0x12   : > { %v1152_v14 = vld [vmem:[%s1577_s2 + $0x30] sm:$0xff] (!%p254_p9)   ;;  %v1154_v16 = vld [vmem:[%s1577_s2 + $0x38] sm:$0xff] (!%p254_p9)   ;;  %v683_v33 = vld [vmem:[%s1579_s4 + $0x88] sm:$0xff] (!%p254_p9) }
  0x13   : > { %967 = vmatpush3.bf16.msra.mxu0 (!%p254_p9), %v1142_v3  ;;  %v1066_v34 = vpack.c.bf16 (!%p254_p9), %v683_v33, %v682_v32  ;;  %v666_v35 = vld [vmem:[%s1579_s4] sm:$0xff] (!%p254_p9)  ;;  %v667_v36 = vld [vmem:[%s1579_s4 + $0x8] sm:$0xff] (!%p254_p9)  ;;  %v684_v38 = vld [vmem:[%s1579_s4 + $0x90] sm:$0xff] (!%p254_p9) }
  0x14   : > { %968 = vmatprep.subr.bf16.mxu0 (!%p254_p9), %v1143_v4  ;;  %v1068_v37 = vpack.c.bf16 (!%p254_p9), %v667_v36, %v666_v35  ;;  %v685_v39 = vld [vmem:[%s1579_s4 + $0x98] sm:$0xff] (!%p254_p9)  ;;  %v668_v41 = vld [vmem:[%s1579_s4 + $0x10] sm:$0xff] (!%p254_p9)  ;;  %v686_v44 = vld [vmem:[%s1579_s4 + $0xa0] sm:$0xff] (!%p254_p9) }
  0x15   : > { %s1590_s15 = smov (!%p292_p10, %s917_s15), 31  ;;  %1067 = vmatprep.subr.bf16.mxu1 %v1066_v34  ;;  %v1070_v40 = vpack.c.bf16 %v685_v39, %v684_v38  ;;  %v669_v42 = vld [vmem:[%s1579_s4 + $0x18] sm:$0xff]  ;;  %v687_v45 = vld [vmem:[%s1579_s4 + $0xa8] sm:$0xff]  ;;  %v670_v47 = vld [vmem:[%s1579_s4 + $0x20] sm:$0xff]  ;;  %s1592_s29 = smov (!%p299_p11, %s920_s29), 3 }
  0x16   : > { %s962_s17 = sshll.u32 %s1590_s15, 3  ;;  %1069 = vmatpush3.bf16.msra.mxu1 %v1068_v37  ;;  %v1072_v43 = vpack.c.bf16 %v669_v42, %v668_v41  ;;  %v1074_v46 = vpack.c.bf16 %v687_v45, %v686_v44  ;;  %v671_v48 = vld [vmem:[%s1579_s4 + $0x28] sm:$0xff]  ;;  %v688_v50 = vld [vmem:[%s1579_s4 + $0xb0] sm:$0xff]  ;;  %v689_v51 = vld [vmem:[%s1579_s4 + $0xb8] sm:$0xff]  ;;  %s921_s18 = sshll.u32 %s1592_s29, 3 }
  0x17   : > { %969 = vmatpush3.bf16.msra.mxu0 %v1144_v5  ;;  %s1369_s22 = scalar_lea.vmem %s1575_s0, %s962_s17  ;;  %1071 = vmatprep.subr.bf16.mxu1 %v1070_v40  ;;  %v1076_v49 = vpack.c.bf16 %v671_v48, %v670_v47  ;;  %v1078_v52 = vpack.c.bf16 %v689_v51, %v688_v50  ;;  %v672_v53 = vld [vmem:[%s1579_s4 + $0x30] sm:$0xff]  ;;  %v673_v54 = vld [vmem:[%s1579_s4 + $0x38] sm:$0xff]  ;;  %v690_v56 = vld [vmem:[%s1579_s4 + $0xc0] sm:$0xff]  ;;  %s1508_s21 = scalar_lea.vmem %s1576_s1, %s921_s18 }
  0x18   : > { %970 = vmatprep.subr.bf16.mxu0 %v1145_v6  ;;  %v1157_v11 = vld [vmem:[%s1369_s22 + $0x4] ss:$8 sps:$4 sm:$0xff]   ;;  %v1155_v17 = vld [vmem:[%s1369_s22] ss:$8 sps:$4 sm:$0xff]   ;;  %v1158_v18 = vld [vmem:[%s1369_s22 + $0x14] ss:$8 sps:$4 sm:$0xff]   ;;  %v1080_v55 = vpack.c.bf16 %v673_v54, %v672_v53 }
  0x19   : > { %569 = vmatprep.mubr.bf16.mxu0 %v1157_v11  ;;  %v1160_v19 = vld [vmem:[%s1369_s22 + $0x10] ss:$8 sps:$4 sm:$0xff]   ;;  %v1161_v20 = vld [vmem:[%s1369_s22 + $0x24] ss:$8 sps:$4 sm:$0xff]   ;;  %v1163_v21 = vld [vmem:[%s1369_s22 + $0x20] ss:$8 sps:$4 sm:$0xff]  }
  0x1a   : > { %v1164_v22 = vld [vmem:[%s1369_s22 + $0x34] ss:$8 sps:$4 sm:$0xff]   ;;  %v1166_v23 = vld [vmem:[%s1369_s22 + $0x30] ss:$8 sps:$4 sm:$0xff]   ;;  %v1167_v24 = vld [vmem:[%s1369_s22 + $0x44] ss:$8 sps:$4 sm:$0xff]   ;;  %1073 = vmatpush3.bf16.msra.mxu1 %v1072_v43 }
  0x1b   : > { %971 = vmatpush3.bf16.msra.mxu0 %v1146_v7  ;;  %v1169_v25 = vld [vmem:[%s1369_s22 + $0x40] ss:$8 sps:$4 sm:$0xff]   ;;  %v1170_v26 = vld [vmem:[%s1369_s22 + $0x54] ss:$8 sps:$4 sm:$0xff]   ;;  %v1172_v27 = vld [vmem:[%s1369_s22 + $0x50] ss:$8 sps:$4 sm:$0xff]   ;;  %1075 = vmatprep.subr.bf16.mxu1 %v1074_v46 }
  0x1c   : > { %972 = vmatprep.subr.bf16.mxu0 %v1147_v8  ;;  %v1173_v28 = vld [vmem:[%s1369_s22 + $0x64] ss:$8 sps:$4 sm:$0xff]   ;;  %v1175_v29 = vld [vmem:[%s1369_s22 + $0x60] ss:$8 sps:$4 sm:$0xff]   ;;  %v1176_v30 = vld [vmem:[%s1369_s22 + $0x74] ss:$8 sps:$4 sm:$0xff]  }
  0x1d   : > { %v1178_v31 = vld [vmem:[%s1369_s22 + $0x70] ss:$8 sps:$4 sm:$0xff]   ;;  %v691_v57 = vld [vmem:[%s1579_s4 + $0xc8] sm:$0xff]  ;;  %v674_v59 = vld [vmem:[%s1579_s4 + $0x40] sm:$0xff]  ;;  %s963_s17 = sshll.u32 %s1311_s28, 8  ;;  %s290_s22 = scalar_lea.vmem [#allocation2], %s916_s13 }
  0x1e   : > { %1077 = vmatpush3.bf16.msra.mxu1 %v1076_v49  ;;  %v1082_v58 = vpack.c.bf16 %v691_v57, %v690_v56  ;;  %v675_v60 = vld [vmem:[%s1579_s4 + $0x48] sm:$0xff]  ;;  %v692_v62 = vld [vmem:[%s1579_s4 + $0xd0] sm:$0xff]  ;;  %v693_v63 = vld [vmem:[%s1579_s4 + $0xd8] sm:$0xff]  ;;  %s838_s18 = sshll.u32 %s290_s22, 4  ;;  %s1247_s28 = smov [#allocation2]   ;;  %s1532_s18 = int_to_ptr.vmem [resolvable:$true] %s838_s18 }
  0x1f   : > { %973 = vmatpush3.bf16.msra.mxu0 %v1148_v9  ;;  %1079 = vmatprep.subr.bf16.mxu1 %v1078_v52  ;;  %v1084_v61 = vpack.c.bf16 %v675_v60, %v674_v59  ;;  %v1086_v0 = vpack.c.bf16 %v693_v63, %v692_v62  ;;  %v676_v1 = vld [vmem:[%s1579_s4 + $0x50] sm:$0xff]  ;;  %v677_v2 = vld [vmem:[%s1579_s4 + $0x58] sm:$0xff]  ;;  %v694_v4 = vld [vmem:[%s1579_s4 + $0xe0] sm:$0xff]  ;;  %s1183_s29 = scalar_lea.vmem %s1532_s18, 256  ;;  %s1187_s15 = sshll.u32 %s1247_s28, 4  ;;  %s1188_s15 = int_to_ptr.vmem [resolvable:$false] %s1187_s15 }
  0x20   : > { %974 = vmatprep.subr.bf16.mxu0 %v1149_v10  ;;  %v1088_v3 = vpack.c.bf16 %v677_v2, %v676_v1  ;;  %v695_v5 = vld [vmem:[%s1579_s4 + $0xe8] sm:$0xff]  ;;  %v678_v7 = vld [vmem:[%s1579_s4 + $0x60] sm:$0xff]  ;;  %v696_v10 = vld [vmem:[%s1579_s4 + $0xf0] sm:$0xff]  ;;  %p1184_p12 = scmp.ne.s32.totalorder %s1532_s18, %s1183_s29  ;;  %s1189_s9 = scalar_lea.vmem %s1188_s15, 512 }
  0x21   : > { %v1090_v6 = vpack.c.bf16 %v695_v5, %v694_v4  ;;  %v679_v8 = vld [vmem:[%s1579_s4 + $0x68] sm:$0xff]  ;;  %v697_v11 = vld [vmem:[%s1579_s4 + $0xf8] sm:$0xff]  ;;  %v922_v41 = vld [vmem:[%s1578_s3] ss:$0 sm:$0xff]  ;;  %p1190_p1 = scmp.lt.s32.totalorder %s1532_s18, %s1188_s15  ;;  %p1191_p2 = scmp.lt.s32.totalorder %s1189_s9, %s1183_s29 }
  0x22   : > { %1081 = vmatpush3.bf16.msra.mxu1 %v1080_v55  ;;  %v1092_v9 = vpack.c.bf16 %v679_v8, %v678_v7  ;;  %p1185_p13 = pnand %p1184_p12, %p1328_p5 }
  0x23   : > { %975 = vmatpush3.bf16.msra.mxu0 %v1150_v12  ;;  %1083 = vmatprep.subr.bf16.mxu1 %v1082_v58  ;;  %v1094_v12 = vpack.c.bf16 %v697_v11, %v696_v10  ;;  %p1192_p3 = por %p1191_p2, %p1190_p1 }
  0x24   : > { %976 = vmatprep.subr.bf16.mxu0 %v1151_v13  ;;  %v680_v13 = vld [vmem:[%s1579_s4 + $0x70] sm:$0xff]  ;;  %p1186_p0 = pneg %p1185_p13 }
  0x26   : > { %1085 = vmatpush3.bf16.msra.mxu1 %v1084_v61  ;;  %p1193_p4 = pnand %p1192_p3, %p1186_p0 }
  0x27   : > { %977 = vmatpush3.bf16.msra.mxu0 %v1152_v14  ;;  %1087 = vmatprep.subr.bf16.mxu1 %v1086_v0  ;;  %v681_v14 = vld [vmem:[%s1579_s4 + $0x78] sm:$0xff] }
  0x28   : > { %978 = vmatprep.subr.bf16.mxu0 %v1153_v15  ;;  %v1096_v15 = vpack.c.bf16 %v681_v14, %v680_v13 }
  0x2a   : > { %1089 = vmatpush3.bf16.msra.mxu1 %v1088_v3 }
  0x2b   : > { %979 = vmatpush3.bf16.msra.mxu0 %v1154_v16  ;;  %1091 = vmatprep.subr.bf16.mxu1 %v1090_v6  ;;  %v1511_v16 = vld [vmem:[%s1508_s21] sm:$0xff] }
  0x2c   : > { %764 = vmatprep.mubr.f32.mxu1 %v1511_v16 }
  0x2e   : > { %570 = vmatmul.mubr.bf16.vlgmr.msra.gmra.mrb[0].mxu0 %v1155_v17  ;;  %1093 = vmatpush3.bf16.msra.mxu1 %v1092_v9 }
  0x2f   : > { %577 = vmatprep.mubr.bf16.mxu0 %v1158_v18  ;;  %1095 = vmatprep.subr.bf16.mxu1 %v1094_v12 }
  0x32   : > { %1097 = vmatpush3.bf16.msra.mxu1 %v1096_v15 }
  0x36   : > { %578 = vmatmul.mubr.bf16.gmra.mrb[4].mxu0 %v1160_v19 }
  0x37   : > { %585 = vmatprep.mubr.bf16.mxu0 %v1161_v20 }
  0x3e   : > { %586 = vmatmul.mubr.bf16.gmra.mrb[8].mxu0 %v1163_v21 }
  0x3f   : > { %593 = vmatprep.mubr.bf16.mxu0 %v1164_v22 }
  0x46   : > { %594 = vmatmul.mubr.bf16.gmra.mrb[12].mxu0 %v1166_v23 }
  0x47   : > { %601 = vmatprep.mubr.bf16.mxu0 %v1167_v24 }
  0x4e   : > { %602 = vmatmul.mubr.bf16.gmra.mrb[16].mxu0 %v1169_v25 }
  0x4f   : > { %609 = vmatprep.mubr.bf16.mxu0 %v1170_v26 }
  0x56   : > { %610 = vmatmul.mubr.bf16.gmra.mrb[20].mxu0 %v1172_v27 }
  0x57   : > { %617 = vmatprep.mubr.bf16.mxu0 %v1173_v28 }
  0x5e   : > { %618 = vmatmul.mubr.bf16.gmra.mrb[24].mxu0 %v1175_v29 }
  0x5f   : > { %625 = vmatprep.mubr.bf16.mxu0 %v1176_v30 }
  0x66   : > { %626 = vmatmul.mubr.bf16.gmra.mrb[28].mxu0 %v1178_v31 }
 0x101   : > { %v980_v17 = vpop.f32.mrb[0].mxu0 }
 0x102   : > { %v981_v18 = vpop.f32.mrb[1].mxu0 }
 0x103   : > { %v982_v19 = vadd.f32 %v981_v18, %v980_v17  ;;  %v983_v20 = vpop.f32.mrb[2].mxu0 }
 0x104   : > { %v984_v21 = vpop.f32.mrb[3].mxu0 }
 0x105   : > { %v985_v22 = vadd.f32 %v984_v21, %v983_v20  ;;  %v572_v44 = vadd.f32 %v982_v19, %v922_v41 }
 0x107   : > { %v575_v48 = vadd.f32 %v985_v22, %v922_v41  ;;  %v634_v51 = vmax.f32 %v572_v44, 0.0 }
 0x109   : > { %v986_v23 = vpop.f32.mrb[4].mxu0  ;;  %v635_v54 = vmax.f32 %v575_v48, 0.0 }
 0x10a   : > { %v987_v24 = vpop.f32.mrb[5].mxu0 }
 0x10b   : > { %v988_v25 = vadd.f32 %v987_v24, %v986_v23  ;;  %v989_v26 = vpop.f32.mrb[6].mxu0 }
 0x10c   : > { %v990_v27 = vpop.f32.mrb[7].mxu0 }
 0x10d   : > { %v991_v28 = vadd.f32 %v990_v27, %v989_v26  ;;  %v580_v59 = vadd.f32 %v988_v25, %v922_v41 }
 0x10f   : > { %v583_v0 = vadd.f32 %v991_v28, %v922_v41  ;;  %v636_v3 = vmax.f32 %v580_v59, 0.0 }
 0x111   : > { %v992_v29 = vpop.f32.mrb[8].mxu0  ;;  %v637_v6 = vmax.f32 %v583_v0, 0.0 }
 0x112   : > { %v993_v30 = vpop.f32.mrb[9].mxu0 }
 0x113   : > { %v994_v31 = vadd.f32 %v993_v30, %v992_v29  ;;  %v995_v32 = vpop.f32.mrb[10].mxu0 }
 0x114   : > { %v996_v33 = vpop.f32.mrb[11].mxu0 }
 0x115   : > { %v997_v34 = vadd.f32 %v996_v33, %v995_v32  ;;  %v588_v11 = vadd.f32 %v994_v31, %v922_v41 }
 0x117   : > { %v591_v17 = vadd.f32 %v997_v34, %v922_v41  ;;  %v638_v20 = vmax.f32 %v588_v11, 0.0 }
 0x119   : > { %v998_v35 = vpop.f32.mrb[12].mxu0  ;;  %v639_v23 = vmax.f32 %v591_v17, 0.0  ;;  %v955_v17 = vld [vmem:[%s1580_s5] ss:$0 sm:$0xff] }
 0x11a   : > { %v999_v36 = vpop.f32.mrb[13].mxu0 }
 0x11b   : > { %v1000_v37 = vadd.f32 %v999_v36, %v998_v35  ;;  %v1001_v38 = vpop.f32.mrb[14].mxu0 }
 0x11c   : > { %v1002_v39 = vpop.f32.mrb[15].mxu0 }
 0x11d   : > { %v1003_v40 = vadd.f32 %v1002_v39, %v1001_v38  ;;  %v596_v28 = vadd.f32 %v1000_v37, %v922_v41  ;;  %v665_v37 = vld [vmem:[%s1508_s21 + $0x8] sm:$0xff]  ;;  %s1530_s21 = scalar_lea.hbm %s1582_s7, %s963_s17 }
 0x11f   : > { %v599_v35 = vadd.f32 %v1003_v40, %v922_v41  ;;  %v640_v39 = vmax.f32 %v596_v28, 0.0 }
 0x121   : > { %v1004_v42 = vpop.f32.mrb[16].mxu0  ;;  %v641_v44 = vmax.f32 %v599_v35, 0.0 }
 0x122   : > { %v1005_v43 = vpop.f32.mrb[17].mxu0 }
 0x123   : > { %v1006_v45 = vadd.f32 %v1005_v43, %v1004_v42  ;;  %v1007_v46 = vpop.f32.mrb[18].mxu0 }
 0x124   : > { %v1008_v47 = vpop.f32.mrb[19].mxu0 }
 0x125   : > { %v604_v49 = vadd.f32 %v1006_v45, %v922_v41  ;;  %v1009_v50 = vadd.f32 %v1008_v47, %v1007_v46 }
 0x127   : > { %v642_v52 = vmax.f32 %v604_v49, 0.0  ;;  %v607_v53 = vadd.f32 %v1009_v50, %v922_v41 }
 0x129   : > { %v650_v55 = vmax.f32 %v634_v51, %v642_v52  ;;  %v643_v56 = vmax.f32 %v607_v53, 0.0  ;;  %v1010_v57 = vpop.f32.mrb[20].mxu0  ;;  %v775_v53 = vmul.f32 0.07768565, %v1511_v16 }
 0x12a   : > { %v1011_v58 = vpop.f32.mrb[21].mxu0 }
 0x12b   : > { %v651_v60 = vmax.f32 %v635_v54, %v643_v56  ;;  %v1012_v61 = vadd.f32 %v1011_v58, %v1010_v57  ;;  %v1013_v62 = vpop.f32.mrb[22].mxu0  ;;  %v776_v58 = vmul.f32 0.07768565, %v665_v37 }
 0x12c   : > { %v1014_v63 = vpop.f32.mrb[23].mxu0 }
 0x12d   : > { %v612_v1 = vadd.f32 %v1012_v61, %v922_v41  ;;  %v1015_v2 = vadd.f32 %v1014_v63, %v1013_v62 }
 0x12f   : > { %v644_v4 = vmax.f32 %v612_v1, 0.0  ;;  %v615_v5 = vadd.f32 %v1015_v2, %v922_v41 }
 0x131   : > { %v652_v7 = vmax.f32 %v636_v3, %v644_v4  ;;  %v645_v8 = vmax.f32 %v615_v5, 0.0  ;;  %v1016_v9 = vpop.f32.mrb[24].mxu0 }
 0x132   : > { %v1017_v10 = vpop.f32.mrb[25].mxu0 }
 0x133   : > { %v653_v12 = vmax.f32 %v637_v6, %v645_v8  ;;  %v1018_v13 = vadd.f32 %v1017_v10, %v1016_v9  ;;  %v1019_v14 = vpop.f32.mrb[26].mxu0 }
 0x134   : > { %v1020_v15 = vpop.f32.mrb[27].mxu0 }
 0x135   : > { %v620_v18 = vadd.f32 %v1018_v13, %v922_v41  ;;  %v1021_v19 = vadd.f32 %v1020_v15, %v1019_v14 }
 0x137   : > { %v646_v21 = vmax.f32 %v620_v18, 0.0  ;;  %v623_v22 = vadd.f32 %v1021_v19, %v922_v41  ;;  %v956_v19 = vld [vmem:[%s1581_s6] ss:$0 sm:$0xff] }
 0x139   : > { %v654_v24 = vmax.f32 %v638_v20, %v646_v21  ;;  %v647_v25 = vmax.f32 %v623_v22, 0.0  ;;  %v1022_v26 = vpop.f32.mrb[28].mxu0 }
 0x13a   : > { %v1023_v27 = vpop.f32.mrb[29].mxu0 }
 0x13b   : > { %v655_v29 = vmax.f32 %v639_v23, %v647_v25  ;;  %v1024_v30 = vadd.f32 %v1023_v27, %v1022_v26  ;;  %v1025_v32 = vpop.f32.mrb[30].mxu0  ;;  %v658_v31 = vmax.f32 %v650_v55, %v654_v24 }
 0x13c   : > { %v1026_v33 = vpop.f32.mrb[31].mxu0 }
 0x13d   : > { %v628_v36 = vadd.f32 %v1024_v30, %v922_v41  ;;  %v1027_v34 = vadd.f32 %v1026_v33, %v1025_v32  ;;  %v659_v38 = vmax.f32 %v651_v60, %v655_v29 }
 0x13f   : > { %v648_v42 = vmax.f32 %v628_v36, 0.0  ;;  %v631_v43 = vadd.f32 %v1027_v34, %v922_v41 }
 0x141   : > { %v656_v45 = vmax.f32 %v640_v39, %v648_v42  ;;  %v649_v46 = vmax.f32 %v631_v43, 0.0 }
 0x143   : > { %v657_v47 = vmax.f32 %v641_v44, %v649_v46  ;;  %v660_v48 = vmax.f32 %v652_v7, %v656_v45 }
 0x145   : > { %v662_v49 = vmax.f32 %v658_v31, %v660_v48  ;;  %v661_v50 = vmax.f32 %v653_v12, %v657_v47 }
 0x147   : > { %765 = vmatmul.mubr.f32.vlgmr.msra.gmra.mrb[0].mxu1 %v662_v49  ;;  %v663_v51 = vmax.f32 %v659_v38, %v661_v50  ;;  %v698_v54 = vmul.f32 0.6991708, %v662_v49 }
 0x148   : > { %769 = vmatprep.mubr.f32.mxu1 %v665_v37 }
 0x149   : > { %v699_v59 = vmul.f32 0.6991708, %v663_v51 }
 0x14b   : > { %770 = vmatmul.mubr.f32.gmra.mrb[2].mxu1 %v663_v51 }
 0x21a   : > { %v1060_v52 = vpop.f32.mrb[0].mxu1 }
 0x21b   : > { %v1061_v40 = vpop.f32.mrb[1].mxu1 }
 0x21c   : > { %v1062_v55 = vadd.f32 %v1061_v40, %v1060_v52 }
 0x21e   : > { %v767_v56 = vadd.f32 %v1062_v55, %v698_v54  ;;  %v1063_v41 = vpop.f32.mrb[2].mxu1 }
 0x21f   : > { %v1064_v57 = vpop.f32.mrb[3].mxu1 }
 0x220   : > { %v1065_v60 = vadd.f32 %v1064_v57, %v1063_v41  ;;  %v777_v61 = vadd.f32 %v775_v53, %v767_v56 }
 0x222   : > { %v772_v62 = vadd.f32 %v1065_v60, %v699_v59  ;;  %v779_v63 = vmax.f32 %v777_v61, 0.0 }
 0x224   : > { %781 = vadd.xlane.f32.xlu0 %v779_v63  ;;  %v778_v0 = vadd.f32 %v776_v58, %v772_v62 }
 0x226   : > { %v780_v1 = vmax.f32 %v778_v0, 0.0 }
 0x228   : > { %783 = vadd.xlane.f32.xlu0 %v780_v1 }
 0x2b1   : > { %v782_v2 = vpop.xlane.xlu0 %781 }
 0x2b2   : > { %v786_v3 = vmul.f32 0.0078125, %v782_v2 }
 0x2b4   : > { %v788_v4 = vsub.f32 %v779_v63, %v786_v3 }
 0x2b5   : > { %v784_v16 = vpop.xlane.xlu0 %783 }
 0x2b6   : > { %v787_v5 = vmul.f32 0.0078125, %v784_v16  ;;  %v790_v6 = vmul.f32 %v788_v4, %v788_v4 }
 0x2b8   : > { %v789_v7 = vsub.f32 %v780_v1, %v787_v5  ;;  %792 = vadd.xlane.f32.xlu1 %v790_v6 }
 0x2ba   : > { %v791_v8 = vmul.f32 %v789_v7, %v789_v7 }
 0x2bc   : > { %794 = vadd.xlane.f32.xlu1 %v791_v8 }
 0x345   : > { %v793_v9 = vpop.xlane.xlu1 %792 }
 0x346   : > { %v796_v10 = vmul.f32 0.0078125, %v793_v9 }
 0x348   : > { %v798_v11 = vadd.f32 1e-05, %v796_v10 }
 0x349   : > { %v795_v12 = vpop.xlane.xlu1 %794 }
 0x34a   : > { %1179 = vrsqrt.f32 %v798_v11  ;;  %v797_v13 = vmul.f32 0.0078125, %v795_v12 }
 0x34c   : > { %v799_v14 = vadd.f32 1e-05, %v797_v13 }
 0x34e   : > { %1181 = vrsqrt.f32 %v799_v14 }
 0x354   : > { %v1180_v15 = vpop.eup %1179 }
 0x355   : > { %v802_v18 = vmul.f32 %v1180_v15, %v788_v4 }
 0x357   : > { %v811_v20 = vmul.f32 %v955_v17, %v802_v18 }
 0x358   : > { %v1182_v21 = vpop.eup %1181 }
 0x359   : > { %v803_v22 = vmul.f32 %v1182_v21, %v789_v7  ;;  %v820_v23 = vadd.f32 %v956_v19, %v811_v20 }
 0x35b   : > { %v812_v24 = vmul.f32 %v955_v17, %v803_v22  ;;  %822 = vst [vmem:[%s290_s22] sm:$0xff] %v820_v23 }
 0x35d   : > { %v821_v25 = vadd.f32 %v956_v19, %v812_v24 }
 0x35f   : > { %823 = vst [vmem:[%s290_s22 + $0x8] sm:$0xff] %v821_v25 }
 0x360   : > { %1196 = shalt.err (!%p1193_p4)
}
 0x361   : > { %s1197_s8 = scalar_lea.hbm %s1530_s21, 256  ;;  %s1201_s16 = scalar_lea.hbm %s1582_s7, 512 }
 0x362   : > { %p1198_p7 = scmp.ne.s32.totalorder %s1530_s21, %s1197_s8  ;;  %p1202_p10 = scmp.lt.u32.totalorder %s1530_s21, %s1582_s7 }
 0x363   : > { %p1203_p11 = scmp.lt.u32.totalorder %s1201_s16, %s1197_s8  ;;  %p1205_p13 = scmp.lt.u32.totalorder %s1197_s8, %s1530_s21 }
 0x364   : > { %p1199_p8 = pnand %p1198_p7, %p1328_p5 }
 0x365   : > { %p1204_p12 = por %p1203_p11, %p1202_p10 }
 0x366   : > { %p1200_p9 = pneg %p1199_p8 }
 0x367   : > { %p1206_p0 = por %p1205_p13, %p1204_p12 }
 0x369   : > { %p1207_p1 = pnand %p1206_p0, %p1200_p9 }
 0x36b   : > { %1210 = shalt.err (!%p1207_p1)
}
 0x36c   : > { %s1248_s19 = smov 128   ;;  %s1249_s20 = smov 8  }
 0x36d   : > { %1098 = dma.vmem_to_hbm [thread:$0]  (%p1328_p5), %s1532_s18, 256, %s1530_s21, %s1534_s23, %s1248_s19, %s1248_s19, %s1249_s20  }
 0x36e PF: > { %p1104_p2 = scmp.ge.s32.totalorder %s1245_s27, 2  ;;  %s853_s29 = sand.u32 1, %s1233_s24  }
 0x36f   : > { %s854_s28 = scalar_lea.sflag [#allocation3], %s853_s29 }
 0x370   : > { %p1101_p3 = pnand %p1104_p2, %p1332_p6 }
 0x372   : > { %1228 = dma.done.wait (!%p1101_p3), %s854_s28, 256  }
 0x373   : > { %1230 = vsyncadd (!%p1101_p3), %s854_s28, 4294967040  ;;  %p17_p4 = scmp.ge.s32.totalorder %s1315_s30, 4   ;;  %s1585_s24 = smov %s1237_s25 }
 0x374   : > { %s1586_s25 = smov %s1241_s26  ;;  %s1587_s26 = smov %s1326_s10 }
 0x375   : > { %s1588_s27 = smov %s1315_s30  ;;  %19 = sbr.rel (!%p17_p4) target bundleno = 3 (0x3), region = 86 }
 0x37c   :  { %859 = vsyncpa [#allocation3], 1 }
 0x37d   :  { %861 = vsyncpa [#allocation3 + $0x1], 1 }

</bundles_post_ra>
